<compile_context>
chip_gen: v5e
topology: v5e:2x2
jax: 0.10.0
libtpu: 0.0.40
codegen_flags: <defaults>
</compile_context>

<pallas_src>
from typing import NamedTuple

import jax
import jax.numpy as jnp
from jax.experimental import pallas as pl
from jax.experimental.pallas import tpu as pltpu

LANE = 128  # vreg lane width (last dim)


def _round_up(n, m):
    return ((n + m - 1) // m) * m


class QnetParams(NamedTuple):
    w1: jax.Array          # (S, Hp)  operand dtype, hidden dim zero-padded to 128 lanes
    b1: jax.Array          # (1, Hp)  f32
    w2: jax.Array          # (Hp, Ap) operand dtype, action dim zero-padded to 128 lanes
    b2: jax.Array          # (1, Ap)  f32
    action_dim: int        # true (unpadded) action dim


def qnet_kernel(x_ref, w1_ref, b1_ref, w2_ref, b2_ref, o_ref):
    S = x_ref.shape[-1]          # true state dim (x is unpadded)
    A = o_ref.shape[-1]          # true action dim (output is unpadded)
    w_dtype = w1_ref.dtype

    x = x_ref[...]               # (TB, S)

    if S <= 16:
        # fc1 on the VPU: S broadcast multiply-adds over full-lane (TB, Hp)
        # tiles.  Avoids padding x's tiny feature dim to 128 lanes in HBM and
        # a degenerate K=S MXU matmul.  Unrolled at trace time (S is static).
        w1 = w1_ref[...].astype(jnp.float32)                 # (S, Hp)
        h = x[:, 0:1].astype(jnp.float32) * w1[0:1, :]        # (TB, Hp)
        for s in range(1, S):
            h = h + x[:, s : s + 1].astype(jnp.float32) * w1[s : s + 1, :]
    else:
        # General path: fc1 on the MXU (Mosaic pads the K=S contraction
        # internally, so W1 stays unpadded along S).
        h = jnp.dot(x.astype(w_dtype), w1_ref[...],
                    preferred_element_type=jnp.float32)

    # Bias + ReLU stay in f32 on the VPU (v5e has no bf16 VPU).
    h = jnp.maximum(h + b1_ref[...], 0.0)
    if w_dtype != jnp.float32:
        h = h.astype(w_dtype)    # bf16 MXU operands only on the bf16 path

    # fc2 on the MXU against the lane-padded resident W2 (Hp x Ap); slice the
    # A live lanes and store the output unpadded (masked 2-lane store).
    out = jnp.dot(h, w2_ref[...], preferred_element_type=jnp.float32)
    out = out + b2_ref[...]
    o_ref[...] = out[:, :A].astype(o_ref.dtype)


def _resident_spec(shape):
    # Constant index_map keeps the (tiny, padded) weights resident in VMEM for
    # the whole grid; Buffered(1) drops the pointless second buffer.
    try:
        return pl.BlockSpec(shape, lambda i: (0, 0), pipeline_mode=pl.Buffered(1))
    except TypeError:  # older jax without pipeline_mode on BlockSpec
        return pl.BlockSpec(shape, lambda i: (0, 0))


def _choose_batch_tiling(B, sublane, *, single_step_max=2048, max_tile_rows=4096):
    """Pick (tile_rows, n_steps, padded_B) for the 1-D batch grid."""
    if B <= single_step_max:
        # Whole batch in one grid step.  Block == full array, so no batch
        # padding and no (8,128) divisibility constraint; per-step overhead
        # (~0.35us) is paid exactly once.
        return B, 1, B
    # Larger batches: prefer exactly 2 "parallel" steps so v7x's two
    # TensorCores split the work; add steps only to keep tiles modest.
    n = 2
    while -(-B // n) > max_tile_rows:
        n *= 2
    tb = _round_up(-(-B // n), sublane)
    bp = _round_up(B, tb)
    return tb, bp // tb, bp


def prepare_qnet_params(w1, b1, w2, b2, *, use_bf16=False):
    """Pad/cast parameters ONCE (hoisted out of the per-step forward).

    w1:(S,H)  b1:(H,) or (1,H)  w2:(H,A)  b2:(A,) or (1,A)
    Hidden/action dims are zero-padded to full 128-lane tiles; padded hidden
    lanes give relu(0+0)=0 against zero W2 rows, padded action lanes are never
    stored, so the math is exact.
    """
    S, H = w1.shape
    A = w2.shape[1]
    Hp = _round_up(H, LANE)
    Ap = _round_up(A, LANE)
    w_dtype = jnp.bfloat16 if use_bf16 else jnp.float32

    w1p = jnp.zeros((S, Hp), w_dtype).at[:, :H].set(w1.astype(w_dtype))
    w2p = jnp.zeros((Hp, Ap), w_dtype).at[:H, :A].set(w2.astype(w_dtype))
    # Biases stay f32: bias-add / ReLU run in f32 on the VPU.
    b1p = jnp.zeros((1, Hp), jnp.float32).at[:, :H].set(
        jnp.reshape(b1, (1, H)).astype(jnp.float32))
    b2p = jnp.zeros((1, Ap), jnp.float32).at[:, :A].set(
        jnp.reshape(b2, (1, A)).astype(jnp.float32))
    return QnetParams(w1p, b1p, w2p, b2p, A)


def qnet_forward(x, params: QnetParams):
    """Fused Qnet forward: relu(x @ W1 + b1) @ W2 + b2.  x:(B,S) -> (B,A)."""
    B, S = x.shape
    Hp = params.w1.shape[1]
    Ap = params.w2.shape[1]
    A = params.action_dim
    out_dtype = x.dtype

    # Sublane granularity for the batch tile (only matters on multi-step grids).
    sublane = 8 * max(1, 4 // jnp.dtype(x.dtype).itemsize)
    TB, n_steps, Bp = _choose_batch_tiling(B, sublane)

    xp = x if Bp == B else jnp.zeros((Bp, S), x.dtype).at[:B].set(x)

    # Advisory cost from true dims (not padded ones).
    cost = pl.CostEstimate(
        flops=2 * B * (S * Hp + Hp * A),
        transcendentals=0,
        bytes_accessed=(x.size * x.dtype.itemsize
                        + params.w1.size * params.w1.dtype.itemsize
                        + params.w2.size * params.w2.dtype.itemsize
                        + (params.b1.size + params.b2.size) * 4
                        + B * A * jnp.dtype(out_dtype).itemsize),
    )

    out = pl.pallas_call(
        qnet_kernel,
        out_shape=jax.ShapeDtypeStruct((Bp, A), out_dtype),
        grid_spec=pltpu.PrefetchScalarGridSpec(
            num_scalar_prefetch=0,
            grid=(n_steps,),
            in_specs=[
                pl.BlockSpec((TB, S), lambda i: (i, 0)),   # x: streamed, feature dim unpadded
                _resident_spec((S, Hp)),                   # W1 (resident)
                _resident_spec((1, Hp)),                   # b1 (resident)
                _resident_spec((Hp, Ap)),                  # W2 (resident)
                _resident_spec((1, Ap)),                   # b2 (resident)
            ],
            out_specs=pl.BlockSpec((TB, A), lambda i: (i, 0)),  # action dim unpadded
        ),
        compiler_params=pltpu.CompilerParams(
            # Batch grid is embarrassingly parallel -> v7x's 2 TCs can split it.
            dimension_semantics=("parallel",),
        ),
        cost_estimate=cost,
    )(xp, params.w1, params.b1, params.w2, params.b2)

    return out if Bp == B else out[:B]


def init_qnet_params(key, state_dim, hidden_dim, action_dim, dtype=jnp.float32):
    """Deterministic init mimicking torch.nn.Linear default (U[-1/sqrt(fan_in), +])."""
    k1, k2, k3, k4 = jax.random.split(key, 4)
    bound1 = 1.0 / jnp.sqrt(jnp.float32(state_dim))
    bound2 = 1.0 / jnp.sqrt(jnp.float32(hidden_dim))
    w1 = jax.random.uniform(k1, (state_dim, hidden_dim), dtype, -bound1, bound1)
    b1 = jax.random.uniform(k2, (1, hidden_dim), dtype, -bound1, bound1)
    w2 = jax.random.uniform(k3, (hidden_dim, action_dim), dtype, -bound2, bound2)
    b2 = jax.random.uniform(k4, (1, action_dim), dtype, -bound2, bound2)
    return w1, b1, w2, b2


def qnet_reference(x, w1, b1, w2, b2):
    h = jnp.maximum(x @ w1 + b1, 0.0)
    return h @ w2 + b2


if __name__ == "__main__":
    # Small shapes consistent with a CartPole-style DQN Qnet.
    batch, state_dim, hidden_dim, action_dim = 2, 4, 32, 2

    key = jax.random.PRNGKey(0)
    kx, kp, kb, kc = jax.random.split(key, 4)
    x = jax.random.normal(kx, (batch, state_dim), jnp.float32)
    w1, b1, w2, b2 = init_qnet_params(kp, state_dim, hidden_dim, action_dim)
    params = prepare_qnet_params(w1, b1, w2, b2)          # pad/cast ONCE

    # Tiny batch: single grid step, zero padding anywhere.
    out = qnet_forward(x, params)
    jax.block_until_ready(out)
    ref = qnet_reference(x, w1, b1, w2, b2)
    assert out.shape == (batch, action_dim)
    assert jnp.allclose(out, ref, atol=1e-5, rtol=1e-5), "mismatch vs reference (small)"

    # DQN-training-sized batch: still a single grid step, unpadded in/out.
    big_batch = 1000
    xb = jax.random.normal(kb, (big_batch, state_dim), jnp.float32)
    out_b = qnet_forward(xb, params)
    jax.block_until_ready(out_b)
    ref_b = qnet_reference(xb, w1, b1, w2, b2)
    assert out_b.shape == (big_batch, action_dim)
    assert jnp.allclose(out_b, ref_b, atol=1e-4, rtol=1e-4), "mismatch vs reference (big)"

    # Large batch: exercises the 2-step "parallel" grid (v7x megacore path)
    # plus batch padding/slicing.
    huge_batch = 4100
    xc = jax.random.normal(kc, (huge_batch, state_dim), jnp.float32)
    out_c = qnet_forward(xc, params)
    jax.block_until_ready(out_c)
    ref_c = qnet_reference(xc, w1, b1, w2, b2)
    assert out_c.shape == (huge_batch, action_dim)
    assert jnp.allclose(out_c, ref_c, atol=1e-4, rtol=1e-4), "mismatch vs reference (huge)"

    # Optional bf16 weight path (fc2 runs bf16 on the MXU) — relaxed tolerance
    # is expected precision loss, not a bug.
    params_bf16 = prepare_qnet_params(w1, b1, w2, b2, use_bf16=True)
    out_h = qnet_forward(xb, params_bf16)
    jax.block_until_ready(out_h)
    assert out_h.shape == (big_batch, action_dim)
    assert jnp.allclose(out_h, ref_b, atol=5e-2, rtol=5e-2), "mismatch vs reference (bf16)"

    print("KERNEL_OK")
</pallas_src>

<mosaic_0001>
module attributes {stable_mosaic.version = 11 : i64} {
  func.func @qnet_kernel(%arg0: i32, %arg1: memref<2x4xf32, #tpu.memory_space<vmem>>, %arg2: memref<4x128xf32, #tpu.memory_space<vmem>>, %arg3: memref<1x128xf32, #tpu.memory_space<vmem>>, %arg4: memref<128x128xf32, #tpu.memory_space<vmem>>, %arg5: memref<1x128xf32, #tpu.memory_space<vmem>>, %arg6: memref<2x2xf32, #tpu.memory_space<vmem>>) attributes {dimension_semantics = [#tpu.dimension_semantics<parallel>], iteration_bounds = array<i64: 1>, scalar_prefetch = 0 : i64, scratch_operands = 0 : i64, tpu.core_type = #tpu.core_type<tc>, window_params = [{transform_indices = @transform_0, window_bounds = array<i64: 2, 4>}, {pipeline_mode = #tpu.pipeline_mode<synchronous>, transform_indices = @transform_1, window_bounds = array<i64: 4, 128>}, {pipeline_mode = #tpu.pipeline_mode<synchronous>, transform_indices = @transform_2, window_bounds = array<i64: 1, 128>}, {pipeline_mode = #tpu.pipeline_mode<synchronous>, transform_indices = @transform_3, window_bounds = array<i64: 128, 128>}, {pipeline_mode = #tpu.pipeline_mode<synchronous>, transform_indices = @transform_4, window_bounds = array<i64: 1, 128>}, {transform_indices = @transform_5, window_bounds = array<i64: 2, 2>}]} {
    %c0 = arith.constant 0 : index
    %c0_0 = arith.constant 0 : index
    %0 = vector.load %arg1[%c0, %c0_0] : memref<2x4xf32, #tpu.memory_space<vmem>>, vector<2x4xf32>
    %c0_1 = arith.constant 0 : index
    %c0_2 = arith.constant 0 : index
    %1 = vector.load %arg2[%c0_1, %c0_2] : memref<4x128xf32, #tpu.memory_space<vmem>>, vector<4x128xf32>
    %2 = vector.extract_strided_slice %0 {offsets = [0, 0], sizes = [2, 1], strides = [1, 1]} : vector<2x4xf32> to vector<2x1xf32>
    %3 = vector.extract_strided_slice %1 {offsets = [0, 0], sizes = [1, 128], strides = [1, 1]} : vector<4x128xf32> to vector<1x128xf32>
    %4 = vector.broadcast %2 : vector<2x1xf32> to vector<2x128xf32>
    %5 = vector.broadcast %3 : vector<1x128xf32> to vector<2x128xf32>
    %6 = arith.mulf %4, %5 : vector<2x128xf32>
    %7 = vector.extract_strided_slice %0 {offsets = [0, 1], sizes = [2, 1], strides = [1, 1]} : vector<2x4xf32> to vector<2x1xf32>
    %8 = vector.extract_strided_slice %1 {offsets = [1, 0], sizes = [1, 128], strides = [1, 1]} : vector<4x128xf32> to vector<1x128xf32>
    %9 = vector.broadcast %7 : vector<2x1xf32> to vector<2x128xf32>
    %10 = vector.broadcast %8 : vector<1x128xf32> to vector<2x128xf32>
    %11 = arith.mulf %9, %10 : vector<2x128xf32>
    %12 = arith.addf %6, %11 : vector<2x128xf32>
    %13 = vector.extract_strided_slice %0 {offsets = [0, 2], sizes = [2, 1], strides = [1, 1]} : vector<2x4xf32> to vector<2x1xf32>
    %14 = vector.extract_strided_slice %1 {offsets = [2, 0], sizes = [1, 128], strides = [1, 1]} : vector<4x128xf32> to vector<1x128xf32>
    %15 = vector.broadcast %13 : vector<2x1xf32> to vector<2x128xf32>
    %16 = vector.broadcast %14 : vector<1x128xf32> to vector<2x128xf32>
    %17 = arith.mulf %15, %16 : vector<2x128xf32>
    %18 = arith.addf %12, %17 : vector<2x128xf32>
    %19 = vector.extract_strided_slice %0 {offsets = [0, 3], sizes = [2, 1], strides = [1, 1]} : vector<2x4xf32> to vector<2x1xf32>
    %20 = vector.extract_strided_slice %1 {offsets = [3, 0], sizes = [1, 128], strides = [1, 1]} : vector<4x128xf32> to vector<1x128xf32>
    %21 = vector.broadcast %19 : vector<2x1xf32> to vector<2x128xf32>
    %22 = vector.broadcast %20 : vector<1x128xf32> to vector<2x128xf32>
    %23 = arith.mulf %21, %22 : vector<2x128xf32>
    %24 = arith.addf %18, %23 : vector<2x128xf32>
    %c0_3 = arith.constant 0 : index
    %c0_4 = arith.constant 0 : index
    %25 = vector.load %arg3[%c0_3, %c0_4] : memref<1x128xf32, #tpu.memory_space<vmem>>, vector<1x128xf32>
    %26 = vector.broadcast %25 : vector<1x128xf32> to vector<2x128xf32>
    %27 = arith.addf %24, %26 : vector<2x128xf32>
    %cst = arith.constant 0.000000e+00 : f32
    %28 = vector.broadcast %cst : f32 to vector<2x128xf32>
    %29 = arith.maximumf %27, %28 : vector<2x128xf32>
    %c0_5 = arith.constant 0 : index
    %c0_6 = arith.constant 0 : index
    %30 = vector.load %arg4[%c0_5, %c0_6] : memref<128x128xf32, #tpu.memory_space<vmem>>, vector<128x128xf32>
    %cst_7 = arith.constant dense<0.000000e+00> : vector<2x128xf32>
    %31 = tpu.matmul %29, %30, %cst_7 {dimension_numbers = #tpu.dot_dimension_numbers<[1], [0], [0], [1], [0, 0, 1, 1], [], []>} : vector<2x128xf32>, vector<128x128xf32>, vector<2x128xf32> -> vector<2x128xf32>
    %c0_8 = arith.constant 0 : index
    %c0_9 = arith.constant 0 : index
    %32 = vector.load %arg5[%c0_8, %c0_9] : memref<1x128xf32, #tpu.memory_space<vmem>>, vector<1x128xf32>
    %33 = vector.broadcast %32 : vector<1x128xf32> to vector<2x128xf32>
    %34 = arith.addf %31, %33 : vector<2x128xf32>
    %35 = vector.extract_strided_slice %34 {offsets = [0, 0], sizes = [2, 2], strides = [1, 1]} : vector<2x128xf32> to vector<2x2xf32>
    %c0_10 = arith.constant 0 : index
    %c0_11 = arith.constant 0 : index
    %36 = vector.load %arg6[%c0_10, %c0_11] : memref<2x2xf32, #tpu.memory_space<vmem>>, vector<2x2xf32>
    tpu.vector_store %arg6[%c0_10, %c0_11], %35 {strides = array<i32>} : memref<2x2xf32, #tpu.memory_space<vmem>>, vector<2x2xf32>,
    return
  }
  func.func @transform_0(%arg0: i32) -> (i32, i32) {
    %c0_i32 = arith.constant 0 : i32
    %c0_i32_0 = arith.constant 0 : i32
    return %arg0, %c0_i32 : i32, i32
  }
  func.func @transform_1(%arg0: i32) -> (i32, i32) {
    %c0_i32 = arith.constant 0 : i32
    %c0_i32_0 = arith.constant 0 : i32
    %c0_i32_1 = arith.constant 0 : i32
    return %c0_i32, %c0_i32_0 : i32, i32
  }
  func.func @transform_2(%arg0: i32) -> (i32, i32) {
    %c0_i32 = arith.constant 0 : i32
    %c0_i32_0 = arith.constant 0 : i32
    %c0_i32_1 = arith.constant 0 : i32
    return %c0_i32, %c0_i32_0 : i32, i32
  }
  func.func @transform_3(%arg0: i32) -> (i32, i32) {
    %c0_i32 = arith.constant 0 : i32
    %c0_i32_0 = arith.constant 0 : i32
    %c0_i32_1 = arith.constant 0 : i32
    return %c0_i32, %c0_i32_0 : i32, i32
  }
  func.func @transform_4(%arg0: i32) -> (i32, i32) {
    %c0_i32 = arith.constant 0 : i32
    %c0_i32_0 = arith.constant 0 : i32
    %c0_i32_1 = arith.constant 0 : i32
    return %c0_i32, %c0_i32_0 : i32, i32
  }
  func.func @transform_5(%arg0: i32) -> (i32, i32) {
    %c0_i32 = arith.constant 0 : i32
    %c0_i32_0 = arith.constant 0 : i32
    return %arg0, %c0_i32 : i32, i32
  }
}

</mosaic_0001>

<bundles_post_ra>
// kernel: tpu_custom_call.1
= control target key start
LH: loop header
LB: loop body
LE: loop exit
PB: predicated region body
PF: predicated region fallthrough
CT: control target
= control target key end

     0   :  { %10 = vsyncpa [#allocation3], 0  ;;  %s337_s0 = inlined_call_operand.hbm [shape: f32[2,4], index: 0, kind: input, shape index: {}]   ;;  %s338_s1 = inlined_call_operand.hbm [shape: f32[4,128], index: 1, kind: input, shape index: {}]   ;;  %s339_s2 = inlined_call_operand.vmem [shape: f32[1,128], index: 2, kind: input, shape index: {}]   ;;  %s340_s3 = inlined_call_operand.hbm [shape: f32[128,128], index: 3, kind: input, shape index: {}]   ;;  %s341_s4 = inlined_call_operand.vmem [shape: f32[1,128], index: 4, kind: input, shape index: {}]   ;;  %s342_s5 = inlined_call_operand.hbm [shape: f32[2,2], index: 5, kind: output, shape index: {}]  }
   0x1   :  { %11 = vsyncpa [#allocation6], 0  ;;  %s29_s20 = sshll.u32 %s338_s1, 4  ;;  %s30_s20 = int_to_ptr.hbm [resolvable:$true] %s29_s20 }
   0x2   :  { %12 = vsyncpa [#allocation4], 0  ;;  %s279_s21 = smov [#allocation5]   ;;  %s18_s25 = sshll.u32 %s337_s0, 4  ;;  %s19_s25 = int_to_ptr.hbm [resolvable:$true] %s18_s25 }
   0x3   :  { %s31_s22 = sshll.u32 %s279_s21, 4  ;;  %s280_s26 = smov [#allocation2]   ;;  %s32_s22 = int_to_ptr.vmem [resolvable:$true] %s31_s22 }
   0x4   :  { %34 = dma.hbm_to_vmem [thread:$0]  %s30_s20, 64, %s32_s22, [#allocation6]  }
   0x5   :  { %s20_s27 = sshll.u32 %s280_s26, 4  ;;  %s41_s30 = sshll.u32 %s340_s3, 4  ;;  %s21_s27 = int_to_ptr.vmem [resolvable:$true] %s20_s27  ;;  %s42_s30 = int_to_ptr.hbm [resolvable:$true] %s41_s30 }
   0x6   :  { %23 = dma.hbm_to_vmem [thread:$0]  %s19_s25, 32, %s21_s27, [#allocation3]  }
   0x7   :  { %s281_s1 = smov [#allocation7]   ;;  %s282_s7 = smov 128  }
   0x8   :  { %s43_s6 = sshll.u32 %s281_s1, 4  ;;  %s283_s8 = smov 8   ;;  %s44_s6 = int_to_ptr.vmem [resolvable:$true] %s43_s6 }
   0x9   :  { %49 = dma.hbm_to_vmem [thread:$0]  %s42_s30, 2048, %s44_s6, [#allocation6], %s282_s7, %s282_s7, %s283_s8  }
   0xa   :  { %273 = dma.done.wait [#allocation3], 32  }
   0xb   :  { %274 = vsyncadd [#allocation3], 4294967264 }
   0xc   :  { %275 = dma.done.wait [#allocation6], 2112  }
   0xd   :  { %276 = vsyncadd [#allocation6], 4294965184  ;;  %v284_v0 = vmov 0   ;;  %v285_v1 = vmov 2   ;;  %v64_v2 = vld [vmem:[#allocation2] sm:$0x3] }
   0xe   :  { %170 = vset.pattern.permute.xlu0 %v284_v0  ;;  %172 = vset.pattern.permute.xlu1 %v285_v1  ;;  %v115_v3 = vld [vmem:[#allocation7 + $0x78] sm:$0xff]  ;;  %v114_v4 = vld [vmem:[#allocation7 + $0x70] sm:$0xff]  ;;  %v113_v5 = vld [vmem:[#allocation7 + $0x68] sm:$0xff]  ;;  %v286_v8 = vmov 1   ;;  %v287_v9 = vmov 3   ;;  %s288_s11 = smov [#allocation8]  }
   0xf   :  { %68 = vperm.xlu0 %170, %v64_v2   ;;  %81 = vperm.xlu1 %172, %v64_v2   ;;  %v112_v6 = vld [vmem:[#allocation7 + $0x60] sm:$0xff]  ;;  %v111_v7 = vld [vmem:[#allocation7 + $0x58] sm:$0xff]  ;;  %v110_v10 = vld [vmem:[#allocation7 + $0x50] sm:$0xff]  ;;  %s147_s12 = sshll.u32 %s288_s11, 4  ;;  %s149_s15 = sshll.u32 %s342_s5, 4  ;;  %vm140_vm0 = vcmask 9216   ;;  %s148_s12 = int_to_ptr.vmem [resolvable:$true] %s147_s12  ;;  %s150_s15 = int_to_ptr.hbm [resolvable:$true] %s149_s15 }
  0x10   :  { %120 = vmatpush.msra.mxu0 %v115_v3  ;;  %v109_v11 = vld [vmem:[#allocation7 + $0x48] sm:$0xff]  ;;  %v108_v12 = vld [vmem:[#allocation7 + $0x40] sm:$0xff]  ;;  %v107_v13 = vld [vmem:[#allocation7 + $0x38] sm:$0xff] }
  0x11   :  { %v106_v14 = vld [vmem:[#allocation7 + $0x30] sm:$0xff]  ;;  %v105_v15 = vld [vmem:[#allocation7 + $0x28] sm:$0xff]  ;;  %v104_v16 = vld [vmem:[#allocation7 + $0x20] sm:$0xff] }
  0x12   :  { %121 = vmatpush.msra.mxu0 %v114_v4  ;;  %v103_v17 = vld [vmem:[#allocation7 + $0x18] sm:$0xff]  ;;  %v102_v18 = vld [vmem:[#allocation7 + $0x10] sm:$0xff]  ;;  %v101_v19 = vld [vmem:[#allocation7 + $0x8] sm:$0xff] }
  0x13   :  { %v100_v20 = vld [vmem:[#allocation7] sm:$0xff]  ;;  %v65_v23 = vld [vmem:[#allocation5] sm:$0xf]  ;;  %v175_v36 = vld [vmem:[%s339_s2] ss:$0 sm:$0xff] }
  0x14   :  { %122 = vmatpush.msra.mxu0 %v113_v5  ;;  %v71_v24 = vperm.slane %v65_v23, 0  ;;  %v77_v25 = vperm.slane %v65_v23, 1  ;;  %v84_v26 = vperm.slane %v65_v23, 2  ;;  %v91_v27 = vperm.slane %v65_v23, 3  ;;  %v176_v40 = vld [vmem:[%s341_s4] ss:$0 sm:$0xff] }
  0x16   :  { %123 = vmatpush.msra.mxu0 %v112_v6 }
  0x17   :  { %171 = vset.pattern.permute.xlu0 %v286_v8  ;;  %173 = vset.pattern.permute.xlu1 %v287_v9 }
  0x18   :  { %74 = vperm.xlu0 %171, %v64_v2   ;;  %88 = vperm.xlu1 %173, %v64_v2  }
  0x19   :  { %124 = vmatpush.msra.mxu0 %v111_v7 }
  0x1b   :  { %125 = vmatpush.msra.mxu0 %v110_v10 }
  0x1d   :  { %126 = vmatpush.msra.mxu0 %v109_v11 }
  0x1f   :  { %127 = vmatpush.msra.mxu0 %v108_v12 }
  0x20   :  { %174 = vset.pattern.permute.xlu0 %v287_v9 }
  0x21   :  { %128 = vmatpush.msra.mxu0 %v107_v13 }
  0x23   :  { %129 = vmatpush.msra.mxu0 %v106_v14 }
  0x25   :  { %130 = vmatpush.msra.mxu0 %v105_v15 }
  0x27   :  { %131 = vmatpush.msra.mxu0 %v104_v16 }
  0x29   :  { %132 = vmatpush.msra.mxu0 %v103_v17 }
  0x2b   :  { %133 = vmatpush.msra.mxu0 %v102_v18 }
  0x2d   :  { %134 = vmatpush.msra.mxu0 %v101_v19 }
  0x2f   :  { %135 = vmatpush.msra.mxu0 %v100_v20 }
  0x81   :  { %v69_v21 = vpop.permute.xlu0 %68  ;;  %v82_v22 = vpop.permute.xlu1 %81 }
  0x82   :  { %v72_v30 = vmul.f32 %v71_v24, %v69_v21  ;;  %v85_v32 = vmul.f32 %v84_v26, %v82_v22 }
  0x8a   :  { %v75_v28 = vpop.permute.xlu0 %74  ;;  %v89_v29 = vpop.permute.xlu1 %88 }
  0x8b   :  { %v78_v31 = vmul.f32 %v77_v25, %v75_v28  ;;  %v92_v34 = vmul.f32 %v91_v27, %v89_v29 }
  0x8d   :  { %v79_v33 = vadd.f32 %v78_v31, %v72_v30 }
  0x8f   :  { %v86_v35 = vadd.f32 %v85_v32, %v79_v33 }
  0x91   :  { %v93_v37 = vadd.f32 %v92_v34, %v86_v35 }
  0x93   :  { %v98_v38 = vadd.f32 %v175_v36, %v93_v37 }
  0x95   :  { %v99_v39 = vmax.f32 %v98_v38, 0.0 }
  0x97   :  { %136 = vmatmul.f32.vlgmr.msra.gmra.mxu0 %v99_v39 }
 0x114   :  { %v137_v41 = vpop.f32.mrf.mxu0 }
 0x115   :  { %v138_v42 = vadd.f32 %v176_v40, %v137_v41 }
 0x117   :  { %141 = vst.msk [vmem:[#allocation8] sm:$0x3] %vm140_vm0, %v138_v42 }
 0x118   :  { %152 = dma.vmem_to_hbm [thread:$0]  %s148_s12, 32, %s150_s15, [#allocation4]  }
 0x119   :  { %277 = dma.done.wait [#allocation4], 32  }
 0x11a   :  { %278 = vsyncadd [#allocation4], 4294967264 }
 0x11b   :  { %157 = vsyncpa [#allocation3], 1 }
 0x11c   :  { %158 = vsyncpa [#allocation6], 1 }
 0x11d   :  { %159 = vsyncpa [#allocation4], 1 }

</bundles_post_ra>
